<compile_context>
chip_gen: v5e
topology: v5e:2x2
jax: 0.10.0
libtpu: 0.0.40
codegen_flags: <defaults>
</compile_context>

<pallas_src>
import functools

import jax
import jax.numpy as jnp
from jax import lax
from jax.experimental import pallas as pl
from jax.experimental.pallas import tpu as pltpu

_LN_EPS = 1e-5  # torch.nn.LayerNorm default


def _round_up(x, m):
    return ((x + m - 1) // m) * m


def _pad_dim(a, axis, target):
    pad = target - a.shape[axis]
    if pad <= 0:
        return a
    widths = [(0, 0)] * a.ndim
    widths[axis] = (0, pad)
    return jnp.pad(a, widths)


# ----------------------------------------------------------------------------
# Kernel 1: row-tiled (optional LayerNorm) -> Linear -> (optional activation)
# ----------------------------------------------------------------------------
def _ln_linear_kernel(x_ref, w_ref, b_ref, g_ref, beta_ref, o_ref, *, use_ln, act):
    x = x_ref[...].astype(jnp.float32)
    if use_ln:
        mean = jnp.mean(x, axis=-1, keepdims=True)
        var = jnp.mean((x - mean) ** 2, axis=-1, keepdims=True)
        x = (x - mean) * lax.rsqrt(var + _LN_EPS)
        x = x * g_ref[...] + beta_ref[...]
    y = jnp.dot(x, w_ref[...], preferred_element_type=jnp.float32) + b_ref[...]
    if act == "sigmoid":
        y = jax.nn.sigmoid(y)
    elif act == "elu":
        y = jnp.where(y > 0, y, jnp.expm1(y))
    o_ref[...] = y.astype(o_ref.dtype)


def ln_linear(x, w, b, gamma=None, beta=None, *, use_ln=False, act="none"):
    m, f_in = x.shape
    f_out = w.shape[1]
    if gamma is None:
        gamma = jnp.ones((f_in,), jnp.float32)
    if beta is None:
        beta = jnp.zeros((f_in,), jnp.float32)
    tm = min(256, _round_up(m, 8))
    mp = _round_up(m, tm)
    xp = _pad_dim(x, 0, mp)
    kernel = functools.partial(_ln_linear_kernel, use_ln=use_ln, act=act)
    out = pl.pallas_call(
        kernel,
        out_shape=jax.ShapeDtypeStruct((mp, f_out), jnp.float32),
        grid_spec=pltpu.PrefetchScalarGridSpec(
            num_scalar_prefetch=0,
            grid=(mp // tm,),
            in_specs=[
                pl.BlockSpec((tm, f_in), lambda i: (i, 0)),
                pl.BlockSpec((f_in, f_out), lambda i: (0, 0)),   # weights resident
                pl.BlockSpec((1, f_out), lambda i: (0, 0)),
                pl.BlockSpec((1, f_in), lambda i: (0, 0)),
                pl.BlockSpec((1, f_in), lambda i: (0, 0)),
            ],
            out_specs=pl.BlockSpec((tm, f_out), lambda i: (i, 0)),
        ),
        compiler_params=pltpu.CompilerParams(dimension_semantics=("parallel",)),
    )(xp, w, b.reshape(1, -1), gamma.reshape(1, -1), beta.reshape(1, -1))
    return out[:m]


# ----------------------------------------------------------------------------
# Kernel 2: per-stalk batched matmul  (d, M, K) @ (d, K, H) -> (d, M, H)
#   grid = (stalk, M-tile, K-tile); K is the reduction axis (last, "arbitrary")
# ----------------------------------------------------------------------------
def _stalk_matmul_kernel(a_ref, b_ref, o_ref, acc_ref):
    @pl.when(pl.program_id(2) == 0)
    def _():
        acc_ref[...] = jnp.zeros_like(acc_ref)

    acc_ref[...] += jnp.dot(a_ref[0], b_ref[0], preferred_element_type=jnp.float32)

    @pl.when(pl.program_id(2) == pl.num_programs(2) - 1)
    def _():
        o_ref[0] = acc_ref[...].astype(o_ref.dtype)


def _stalk_tiles(m, k):
    tm = m if m <= 256 else 256
    tk = k if k <= 512 else 512
    return tm, tk, _round_up(m, tm), _round_up(k, tk)


def stalk_matmul(a, b):
    d, m, k = a.shape
    h = b.shape[-1]
    tm, tk, mp, kp = _stalk_tiles(m, k)
    a = _pad_dim(_pad_dim(a, 1, mp), 2, kp)
    b = _pad_dim(b, 1, kp)
    out = pl.pallas_call(
        _stalk_matmul_kernel,
        out_shape=jax.ShapeDtypeStruct((d, mp, h), jnp.float32),
        grid_spec=pltpu.PrefetchScalarGridSpec(
            num_scalar_prefetch=0,
            grid=(d, mp // tm, kp // tk),
            in_specs=[
                pl.BlockSpec((1, tm, tk), lambda r, i, kk: (r, i, kk)),
                pl.BlockSpec((1, tk, h), lambda r, i, kk: (r, kk, 0)),
            ],
            out_specs=pl.BlockSpec((1, tm, h), lambda r, i, kk: (r, i, 0)),
            scratch_shapes=[pltpu.VMEM((tm, h), jnp.float32)],
        ),
        compiler_params=pltpu.CompilerParams(
            dimension_semantics=("parallel", "parallel", "arbitrary")),
    )(a, b)
    return out[:, :m]


# ----------------------------------------------------------------------------
# Kernel 3: per-stalk diffusion finalize  Y = data_x - H_left @ out_e + bias (+ELU)
# ----------------------------------------------------------------------------
def _stalk_diffuse_kernel(h_ref, e_ref, dx_ref, bias_ref, o_ref, acc_ref, *, apply_elu):
    @pl.when(pl.program_id(2) == 0)
    def _():
        acc_ref[...] = jnp.zeros_like(acc_ref)

    acc_ref[...] += jnp.dot(h_ref[0], e_ref[0], preferred_element_type=jnp.float32)

    @pl.when(pl.program_id(2) == pl.num_programs(2) - 1)
    def _():
        y = dx_ref[0].astype(jnp.float32) - acc_ref[...] + bias_ref[...]
        if apply_elu:
            y = jnp.where(y > 0, y, jnp.expm1(y))
        o_ref[0] = y.astype(o_ref.dtype)


def stalk_diffuse(h_left, out_e, data_x, bias, *, apply_elu):
    d, n, e = h_left.shape
    hc = out_e.shape[-1]
    tm, tk, np_, ep = _stalk_tiles(n, e)
    h_left = _pad_dim(_pad_dim(h_left, 1, np_), 2, ep)
    out_e = _pad_dim(out_e, 1, ep)
    data_x = _pad_dim(data_x, 1, np_)
    kernel = functools.partial(_stalk_diffuse_kernel, apply_elu=apply_elu)
    out = pl.pallas_call(
        kernel,
        out_shape=jax.ShapeDtypeStruct((d, np_, hc), jnp.float32),
        grid_spec=pltpu.PrefetchScalarGridSpec(
            num_scalar_prefetch=0,
            grid=(d, np_ // tm, ep // tk),
            in_specs=[
                pl.BlockSpec((1, tm, tk), lambda r, i, kk: (r, i, kk)),
                pl.BlockSpec((1, tk, hc), lambda r, i, kk: (r, kk, 0)),
                pl.BlockSpec((1, tm, hc), lambda r, i, kk: (r, i, 0)),
                pl.BlockSpec((1, hc), lambda r, i, kk: (0, 0)),
            ],
            out_specs=pl.BlockSpec((1, tm, hc), lambda r, i, kk: (r, i, 0)),
            scratch_shapes=[pltpu.VMEM((tm, hc), jnp.float32)],
        ),
        compiler_params=pltpu.CompilerParams(
            dimension_semantics=("parallel", "parallel", "arbitrary")),
    )(h_left, out_e, data_x, bias.reshape(1, -1))
    return out[:, :n]


# ----------------------------------------------------------------------------
# Full forward (glue in plain JAX: reshapes, gathers, incidence scatter, degrees)
# ----------------------------------------------------------------------------
def sheaf_hypergnn_forward(params, x, edge_index, hyperedge_attr,
                           node_types, hyperedge_types, *, num_nodes, num_edges,
                           d, hidden):
    del node_types, hyperedge_types  # unused for sheaf_pred_block='local_concat'

    # self.lin : Linear(F -> hidden*d), input_norm=False
    x_lin = ln_linear(x, params["lin_w"], params["lin_b"], use_ln=False)
    e_lin = ln_linear(hyperedge_attr, params["lin_w"], params["lin_b"], use_ln=False)

    # stalk-major layout: row n*d + r of x.view(N*d, hidden) == x_stalk[r, n, :]
    x_stalk = x_lin.reshape(num_nodes, d, hidden).transpose(1, 0, 2)   # (d, N, h)
    e_stalk = e_lin.reshape(num_edges, d, hidden).transpose(1, 0, 2)   # (d, E, h)

    # ---- SheafBuilderDiag ('local_concat', sigmoid act) ----
    x_avg = x_stalk.mean(axis=0)                                       # (N, h)
    e_avg = e_stalk.mean(axis=0)                                       # (E, h)
    row, col = edge_index[0], edge_index[1]
    feat = jnp.concatenate([x_avg[row], e_avg[col]], axis=-1)          # (K, 2h)
    h_sheaf = ln_linear(feat, params["sheaf_w"], params["sheaf_b"],
                        params["sheaf_g"], params["sheaf_beta"],
                        use_ln=True, act="sigmoid")                    # (K, d)

    # pad N/E to sublane-friendly sizes once; padded rows/cols stay exactly zero in H
    np_ = _round_up(num_nodes, 8)
    ep_ = _round_up(num_edges, 8)

    # per-stalk incidence: dense (Nd x Ed) sheaf is block-diagonal over stalks,
    # so only d slices of shape (N, E) are nonzero.
    H = jnp.zeros((d, np_, ep_), jnp.float32)
    H = H.at[:, row, col].add(h_sheaf.T)                               # (d, N, E)

    # degree_norm: degrees hoisted out of the conv kernels (identical for both layers)
    d_sum = jnp.zeros((np_, d), jnp.float32).at[row].add(h_sheaf)      # node degrees
    b_sum = jnp.zeros((ep_, d), jnp.float32).at[col].add(h_sheaf)      # hyperedge degrees
    d_inv = jnp.where(d_sum != 0.0, 1.0 / d_sum, 0.0).T[:, :, None]    # (d, N, 1)
    b_inv = jnp.where(b_sum != 0.0, 1.0 / b_sum, 0.0).T[:, :, None]    # (d, E, 1)
    h_left = (d_inv * H).astype(jnp.bfloat16)                          # D^-1 H      (d,N,E)
    ht_right = (b_inv * H.transpose(0, 2, 1)).astype(jnp.bfloat16)     # (B^-1 H^T)  (d,E,N)

    # ---- conv stack (num_layers = 2, HyperDiffusionDiagSheafConv, degree_norm) ----
    feats = _pad_dim(x_stalk, 1, np_)                                  # (d, N, h)
    for layer in range(2):
        pw = params[f"conv{layer}_w"]
        pb = params[f"conv{layer}_b"]
        pg = params[f"conv{layer}_g"]
        pbeta = params[f"conv{layer}_beta"]
        pbias = params[f"conv{layer}_bias"]
        # conv.lin: LayerNorm + Linear (AllSet MLP, num_layers=1, InputNorm=True)
        data_x = ln_linear(feats.reshape(d * np_, hidden), pw, pb, pg, pbeta,
                           use_ln=True).reshape(d, np_, hidden)
        # nodes -> hyperedges:  B^-1 H^T X~  (bf16 MXU operands, f32 accumulation)
        out_e = stalk_matmul(ht_right, data_x.astype(jnp.bfloat16))    # (d, E, h)
        # hyperedges -> nodes + finalize:  X~ - D^-1 H (.) + bias, ELU
        # TODO(synk): diffusion form reconstructed from the reference implementation.
        feats = stalk_diffuse(h_left, out_e.astype(jnp.bfloat16), data_x, pbias,
                              apply_elu=True)                          # (d, N, h)
        # F.dropout(training=False) == identity; final ELU commutes with the reshape.

    feats = feats[:, :num_nodes]                                       # drop node padding
    return feats.transpose(1, 0, 2).reshape(num_nodes, hidden * d)


# ----------------------------------------------------------------------------
# Deterministic parameter init (synthetic; shapes follow the module __init__)
# ----------------------------------------------------------------------------
def init_params(key, in_channels, hidden, d):
    ks = jax.random.split(key, 8)

    def dense(k, fan_in, fan_out):
        return (jax.random.normal(k, (fan_in, fan_out), jnp.float32)
                / jnp.sqrt(jnp.float32(fan_in)))

    p = {
        "lin_w": dense(ks[0], in_channels, hidden * d),
        "lin_b": 0.01 * jax.random.normal(ks[1], (hidden * d,), jnp.float32),
        "sheaf_w": dense(ks[2], 2 * hidden, d),
        "sheaf_b": 0.01 * jax.random.normal(ks[3], (d,), jnp.float32),
        "sheaf_g": jnp.ones((2 * hidden,), jnp.float32),
        "sheaf_beta": jnp.zeros((2 * hidden,), jnp.float32),
    }
    for i, (kw, kb) in enumerate(((ks[4], ks[5]), (ks[6], ks[7]))):
        p[f"conv{i}_w"] = dense(kw, hidden, hidden)
        p[f"conv{i}_b"] = 0.01 * jax.random.normal(kb, (hidden,), jnp.float32)
        p[f"conv{i}_g"] = jnp.ones((hidden,), jnp.float32)
        p[f"conv{i}_beta"] = jnp.zeros((hidden,), jnp.float32)
        p[f"conv{i}_bias"] = jnp.zeros((hidden,), jnp.float32)  # zeros() init in the module
    return p


if __name__ == "__main__":
    N, E, F, HIDDEN, D = 8, 4, 12, 16, 6  # nodes, hyperedges, in_channels, hidden, stalk dim

    key = jax.random.PRNGKey(0)
    kx, ke, kp = jax.random.split(key, 3)
    x = jax.random.normal(kx, (N, F), jnp.float32)
    hyperedge_attr = jax.random.normal(ke, (E, F), jnp.float32)  # init_hedge='rand'
    edge_index = jnp.array([[0, 1, 2, 3, 2, 3, 4, 5, 4, 5, 6, 7],
                            [0, 0, 0, 0, 1, 1, 1, 1, 2, 2, 3, 3]], dtype=jnp.int32)
    node_types = jnp.zeros((N,), jnp.int32)        # unused for 'local_concat'
    hyperedge_types = jnp.zeros((E,), jnp.int32)   # unused for 'local_concat'

    params = init_params(kp, F, HIDDEN, D)

    out = sheaf_hypergnn_forward(params, x, edge_index, hyperedge_attr,
                                 node_types, hyperedge_types,
                                 num_nodes=N, num_edges=E, d=D, hidden=HIDDEN)
    out = jax.block_until_ready(out)
    assert out.shape == (N, HIDDEN * D), out.shape
    assert bool(jnp.all(jnp.isfinite(out)))
    print("KERNEL_OK")
</pallas_src>

<mosaic_0001>
module attributes {stable_mosaic.version = 11 : i64} {
  func.func @_ln_linear_kernel(%arg0: i32, %arg1: memref<8x12xf32, #tpu.memory_space<vmem>>, %arg2: memref<12x96xf32, #tpu.memory_space<vmem>>, %arg3: memref<1x96xf32, #tpu.memory_space<vmem>>, %arg4: memref<1x12xf32, #tpu.memory_space<vmem>>, %arg5: memref<1x12xf32, #tpu.memory_space<vmem>>, %arg6: memref<8x96xf32, #tpu.memory_space<vmem>>) attributes {dimension_semantics = [#tpu.dimension_semantics<parallel>], iteration_bounds = array<i64: 1>, scalar_prefetch = 0 : i64, scratch_operands = 0 : i64, tpu.core_type = #tpu.core_type<tc>, window_params = [{transform_indices = @transform_0, window_bounds = array<i64: 8, 12>}, {pipeline_mode = #tpu.pipeline_mode<synchronous>, transform_indices = @transform_1, window_bounds = array<i64: 12, 96>}, {pipeline_mode = #tpu.pipeline_mode<synchronous>, transform_indices = @transform_2, window_bounds = array<i64: 1, 96>}, {pipeline_mode = #tpu.pipeline_mode<synchronous>, transform_indices = @transform_3, window_bounds = array<i64: 1, 12>}, {pipeline_mode = #tpu.pipeline_mode<synchronous>, transform_indices = @transform_4, window_bounds = array<i64: 1, 12>}, {transform_indices = @transform_5, window_bounds = array<i64: 8, 96>}]} {
    %c0 = arith.constant 0 : index
    %c0_0 = arith.constant 0 : index
    %0 = vector.load %arg1[%c0, %c0_0] : memref<8x12xf32, #tpu.memory_space<vmem>>, vector<8x12xf32>
    %c0_1 = arith.constant 0 : index
    %c0_2 = arith.constant 0 : index
    %1 = vector.load %arg2[%c0_1, %c0_2] : memref<12x96xf32, #tpu.memory_space<vmem>>, vector<12x96xf32>
    %cst = arith.constant dense<0.000000e+00> : vector<8x96xf32>
    %2 = tpu.matmul %0, %1, %cst {dimension_numbers = #tpu.dot_dimension_numbers<[1], [0], [0], [1], [0, 0, 1, 1], [], []>} : vector<8x12xf32>, vector<12x96xf32>, vector<8x96xf32> -> vector<8x96xf32>
    %c0_3 = arith.constant 0 : index
    %c0_4 = arith.constant 0 : index
    %3 = vector.load %arg3[%c0_3, %c0_4] : memref<1x96xf32, #tpu.memory_space<vmem>>, vector<1x96xf32>
    %4 = vector.broadcast %3 : vector<1x96xf32> to vector<8x96xf32>
    %5 = arith.addf %2, %4 : vector<8x96xf32>
    %c0_5 = arith.constant 0 : index
    %c0_6 = arith.constant 0 : index
    %6 = vector.load %arg6[%c0_5, %c0_6] : memref<8x96xf32, #tpu.memory_space<vmem>>, vector<8x96xf32>
    tpu.vector_store %arg6[%c0_5, %c0_6], %5 {strides = array<i32>} : memref<8x96xf32, #tpu.memory_space<vmem>>, vector<8x96xf32>,
    return
  }
  func.func @transform_0(%arg0: i32) -> (i32, i32) {
    %c0_i32 = arith.constant 0 : i32
    %c0_i32_0 = arith.constant 0 : i32
    return %arg0, %c0_i32 : i32, i32
  }
  func.func @transform_1(%arg0: i32) -> (i32, i32) {
    %c0_i32 = arith.constant 0 : i32
    %c0_i32_0 = arith.constant 0 : i32
    %c0_i32_1 = arith.constant 0 : i32
    return %c0_i32, %c0_i32_0 : i32, i32
  }
  func.func @transform_2(%arg0: i32) -> (i32, i32) {
    %c0_i32 = arith.constant 0 : i32
    %c0_i32_0 = arith.constant 0 : i32
    %c0_i32_1 = arith.constant 0 : i32
    return %c0_i32, %c0_i32_0 : i32, i32
  }
  func.func @transform_3(%arg0: i32) -> (i32, i32) {
    %c0_i32 = arith.constant 0 : i32
    %c0_i32_0 = arith.constant 0 : i32
    %c0_i32_1 = arith.constant 0 : i32
    return %c0_i32, %c0_i32_0 : i32, i32
  }
  func.func @transform_4(%arg0: i32) -> (i32, i32) {
    %c0_i32 = arith.constant 0 : i32
    %c0_i32_0 = arith.constant 0 : i32
    %c0_i32_1 = arith.constant 0 : i32
    return %c0_i32, %c0_i32_0 : i32, i32
  }
  func.func @transform_5(%arg0: i32) -> (i32, i32) {
    %c0_i32 = arith.constant 0 : i32
    %c0_i32_0 = arith.constant 0 : i32
    return %arg0, %c0_i32 : i32, i32
  }
}

</mosaic_0001>

<bundles_post_ra>
// kernel: tpu_custom_call.1
= control target key start
LH: loop header
LB: loop body
LE: loop exit
PB: predicated region body
PF: predicated region fallthrough
CT: control target
= control target key end

     0   :  { %10 = vsyncpa [#allocation3], 0  ;;  %s239_s0 = inlined_call_operand.hbm [shape: f32[8,12], index: 0, kind: input, shape index: {}]   ;;  %s240_s1 = inlined_call_operand.hbm [shape: f32[12,96], index: 1, kind: input, shape index: {}]   ;;  %s241_s2 = inlined_call_operand.vmem [shape: f32[1,96], index: 2, kind: input, shape index: {}]   ;;  %s242_s3 = inlined_call_operand.vmem [shape: f32[1,12], index: 3, kind: input, shape index: {}]   ;;  %s243_s4 = inlined_call_operand.vmem [shape: f32[1,12], index: 4, kind: input, shape index: {}]   ;;  %s244_s5 = inlined_call_operand.hbm [shape: f32[8,96], index: 5, kind: output, shape index: {}]  }
   0x1   :  { %11 = vsyncpa [#allocation6], 0 }
   0x2   :  { %12 = vsyncpa [#allocation4], 0  ;;  %s18_s20 = sshll.u32 %s239_s0, 4  ;;  %s192_s21 = smov [#allocation2]   ;;  %s19_s20 = int_to_ptr.hbm [resolvable:$true] %s18_s20 }
   0x3   :  { %s20_s22 = sshll.u32 %s192_s21, 4  ;;  %s28_s3 = sshll.u32 %s240_s1, 4  ;;  %s21_s22 = int_to_ptr.vmem [resolvable:$true] %s20_s22  ;;  %s29_s3 = int_to_ptr.hbm [resolvable:$true] %s28_s3 }
   0x4   :  { %23 = dma.hbm_to_vmem [thread:$0]  %s19_s20, 128, %s21_s22, [#allocation3]  }
   0x5   :  { %s193_s4 = smov [#allocation5]   ;;  %s194_s26 = smov 128  }
   0x6   :  { %s30_s25 = sshll.u32 %s193_s4, 4  ;;  %s195_s27 = smov 8   ;;  %s31_s25 = int_to_ptr.vmem [resolvable:$true] %s30_s25 }
   0x7   :  { %36 = dma.hbm_to_vmem [thread:$0]  %s29_s3, 256, %s31_s25, [#allocation6], %s194_s26, %s194_s26, %s195_s27  }
   0x8   :  { %186 = dma.done.wait [#allocation3], 128  }
   0x9   :  { %187 = vsyncadd [#allocation3], 4294967168 }
   0xa   :  { %188 = dma.done.wait [#allocation6], 256  }
   0xb   :  { %189 = vsyncadd [#allocation6], 4294967040  ;;  %vm62_vm0 = vcmask 1043456   ;;  %v53_v0 = vld [vmem:[#allocation5 + $0x8] sm:$0xf]  ;;  %v52_v1 = vld [vmem:[#allocation5] sm:$0xff] }
   0xc   :  { %106 = vmatpush.msk.msra.mxu0 %vm62_vm0, %v53_v0  ;;  %v51_v2 = vld [vmem:[#allocation2] sm:$0xff]  ;;  %vm58_vm1 = vcmask 97280   ;;  %s196_s28 = smov [#allocation7]   ;;  %s95_s7 = sshll.u32 %s244_s5, 4  ;;  %vm86_vm2 = vcmask 785408   ;;  %s96_s7 = int_to_ptr.hbm [resolvable:$true] %s95_s7 }
   0xd   :  { %v113_v3 = vld [vmem:[%s241_s2] ss:$0 sm:$0xff]  ;;  %s93_s29 = sshll.u32 %s196_s28, 4  ;;  %s94_s29 = int_to_ptr.vmem [resolvable:$true] %s93_s29 }
   0xe   :  { %81 = vmatpush.msra.mxu0 %v52_v1 }
   0xf   :  { %107 = vmatmul.msk.f32.vlgmr.msra.gmra.mxu0 %vm58_vm1, %v51_v2 }
  0x8c   :  { %v83_v4 = vpop.f32.mrf.mxu0 }
  0x8d   :  { %v84_v5 = vadd.f32 %v113_v3, %v83_v4 }
  0x8f   :  { %87 = vst.msk [vmem:[#allocation7] sm:$0xff] %vm86_vm2, %v84_v5 }
  0x90   :  { %98 = dma.vmem_to_hbm [thread:$0]  %s94_s29, 128, %s96_s7, [#allocation4]  }
  0x91   :  { %190 = dma.done.wait [#allocation4], 128  }
  0x92   :  { %191 = vsyncadd [#allocation4], 4294967168 }
  0x93   :  { %103 = vsyncpa [#allocation3], 1 }
  0x94   :  { %104 = vsyncpa [#allocation6], 1 }
  0x95   :  { %105 = vsyncpa [#allocation4], 1 }

</bundles_post_ra>
